<compile_context>
chip_gen: v6e
topology: v6e:2x2x1
jax: 0.10.0
libtpu: 0.0.40
codegen_flags: <defaults>
</compile_context>

<pallas_src>
import numpy as np
import jax
import jax.numpy as jnp
from jax.experimental import pallas as pl
from jax.experimental.pallas import tpu as pltpu


# ---------------------------------------------------------------------------
# Tunables
# ---------------------------------------------------------------------------
_MAX_TB = 64     # samples per block (sublane-dense, keeps z tiles modest)
_MAX_TL = 512    # L-tile once L exceeds it (multiple of 128 for lane tiling)


def _pick_block_n(n):
    return n if n <= _MAX_TB else _MAX_TB


def _pick_block_l(length):
    return length if length <= _MAX_TL else _MAX_TL


# ---------------------------------------------------------------------------
# In-kernel building blocks
# ---------------------------------------------------------------------------

def _first_layer(x, w1, b1):
    """z[b,h,l] = sum_c w1[c,h] * x[b,c,l] + b1[h]   (all f32, VPU FMAs).

    K = C is tiny (e.g. 4) so the MXU would be <3% utilized; C broadcast
    FMAs on the VPU are cheaper and keep everything in f32.
    x: (B, C, TL), w1: (C, H), b1: (H, 1)  ->  (B, H, TL)
    """
    c_in = x.shape[1]
    z = x[:, 0:1, :] * w1[0:1, :][:, :, None] + b1[None, :, :]
    for c in range(1, c_in):              # static python loop, unrolled
        z = z + x[:, c:c + 1, :] * w1[c:c + 1, :][:, :, None]
    return z


def _normalize_rows(e):
    """Row-wise L2 normalize; eps^2 matches F.normalize eps=1e-12. EUP rsqrt."""
    ssq = jnp.sum(e * e, axis=-1, keepdims=True)
    return e * jax.lax.rsqrt(jnp.maximum(ssq, 1e-24))


# ---------------------------------------------------------------------------
# Kernels (factories close over static shape info)
# ---------------------------------------------------------------------------

def _make_mixup_kernel(L, TL, B, D):
    needs_mask = (L % TL) != 0
    inv_L = 1.0 / float(L)

    def kernel(lam_ref, x0_ref, x1_ref, w1_ref, b1_ref, w2_ref, b2_ref,
               out_ref, p0_acc, pa_acc):
        j = pl.program_id(1)

        @pl.when(j == 0)
        def _():
            p0_acc[...] = jnp.zeros_like(p0_acc)
            pa_acc[...] = jnp.zeros_like(pa_acc)

        lam = lam_ref[0]
        w1 = w1_ref[...]                               # (C, H) f32
        b1 = b1_ref[...]                               # (H, 1) f32

        # First (linear) layer runs only twice; the mixed branch reuses z0/z1
        # by linearity: W(l*x0+(1-l)*x1)+b = l*(Wx0+b)+(1-l)*(Wx1+b).
        z0 = _first_layer(x0_ref[...], w1, b1)         # (B, H, TL)
        z1 = _first_layer(x1_ref[...], w1, b1)         # (B, H, TL)
        za = z1 + lam * (z0 - z1)                      # ts_aug never built

        h0 = jnp.maximum(z0, 0.0)
        ha = jnp.maximum(za, 0.0)
        if needs_mask:                                 # static python branch
            col = j * TL + jax.lax.broadcasted_iota(jnp.int32, (1, 1, TL), 2)
            valid = col < L
            h0 = jnp.where(valid, h0, 0.0)
            ha = jnp.where(valid, ha, 0.0)

        # Pooled-SUM accumulators (1/L folded in at finalize); lane reduction.
        p0_acc[...] += jnp.sum(h0, axis=-1)            # (B, H)
        pa_acc[...] += jnp.sum(ha, axis=-1)            # (B, H)

        @pl.when(j == pl.num_programs(1) - 1)
        def _():
            pooled = jnp.concatenate([p0_acc[...], pa_acc[...]], axis=0)
            pooled = pooled * inv_L                    # (2B, H)
            # Single batched second-layer matmul (the only MXU-worthy shape).
            e = jnp.dot(pooled, w2_ref[...],
                        preferred_element_type=jnp.float32) + b2_ref[...]
            e = _normalize_rows(e)                     # (2B, D)
            out_ref[...] = e.reshape(2, B, D).astype(out_ref.dtype)

    return kernel


def _make_encode_kernel(L, TL, B, D):
    needs_mask = (L % TL) != 0
    inv_L = 1.0 / float(L)

    def kernel(x_ref, w1_ref, b1_ref, w2_ref, b2_ref, out_ref, p_acc):
        j = pl.program_id(1)

        @pl.when(j == 0)
        def _():
            p_acc[...] = jnp.zeros_like(p_acc)

        z = _first_layer(x_ref[...], w1_ref[...], b1_ref[...])
        h = jnp.maximum(z, 0.0)
        if needs_mask:
            col = j * TL + jax.lax.broadcasted_iota(jnp.int32, (1, 1, TL), 2)
            h = jnp.where(col < L, h, 0.0)
        p_acc[...] += jnp.sum(h, axis=-1)              # (B, H)

        @pl.when(j == pl.num_programs(1) - 1)
        def _():
            pooled = p_acc[...] * inv_L
            e = jnp.dot(pooled, w2_ref[...],
                        preferred_element_type=jnp.float32) + b2_ref[...]
            out_ref[...] = _normalize_rows(e).astype(out_ref.dtype)

    return kernel


# ---------------------------------------------------------------------------
# Python wrappers
# ---------------------------------------------------------------------------

_VMEM = pl.BlockSpec(memory_space=pltpu.MemorySpace.VMEM)
_SMEM = pl.BlockSpec(memory_space=pltpu.MemorySpace.SMEM)


def _prep_params(params):
    """(W1 (C,H), b1 (1,H), W2 (H,D), b2 (1,D)) -> kernel layouts, all f32."""
    w1, b1, w2, b2 = params
    w1 = jnp.asarray(w1, jnp.float32)                       # (C, H)
    b1 = jnp.asarray(b1, jnp.float32).reshape(1, -1).T      # (H, 1)
    w2 = jnp.asarray(w2, jnp.float32)                       # (H, D)
    b2 = jnp.asarray(b2, jnp.float32).reshape(1, -1)        # (1, D)
    return w1, b1, w2, b2


def mixup_forward_augment(ts_ncl, params, alpha=1.0, rng=None):
    """Replicates MixingUpEncoder.forward(ts, is_augment=True).

    ts_ncl: (N, C_in, L) float32, native PyTorch NCL layout.
    Returns (emb0, emb1, emb_aug, lam) with emb* of shape (N, out_dim).
    """
    if rng is None:
        rng = np.random.RandomState(0)
    ts = jnp.asarray(ts_ncl, jnp.float32)                   # (N, C, L)
    N, C, L = ts.shape
    order = rng.permutation(N).astype(np.int32)              # host-side RNG
    lam = float(rng.beta(alpha, alpha))                      # host-side RNG

    w1, b1, w2, b2 = _prep_params(params)
    H, D = w2.shape

    order_arr = jnp.asarray(order)
    # One contiguous HBM gather up front beats N tiny per-sample DMAs.
    ts1 = jnp.take(ts, order_arr, axis=0)
    lam_arr = jnp.asarray([lam], dtype=jnp.float32)

    B = _pick_block_n(N)
    TL = _pick_block_l(L)
    nb, lb = pl.cdiv(N, B), pl.cdiv(L, TL)

    x_spec = pl.BlockSpec((B, C, TL), lambda i, j: (i, 0, j))
    out_spec = pl.BlockSpec((2, B, D), lambda i, j: (0, i, 0))

    flops = int(N * L * (4 * C * H + 7 * H) + 2 * N * (2 * H * D + 4 * D))
    bytes_accessed = int((2 * N * C * L + 2 * N * D) * 4
                         + (C * H + H + H * D + D) * 4)

    out = pl.pallas_call(
        _make_mixup_kernel(L, TL, B, D),
        out_shape=jax.ShapeDtypeStruct((2, N, D), jnp.float32),
        grid=(nb, lb),
        in_specs=[_SMEM, x_spec, x_spec, _VMEM, _VMEM, _VMEM, _VMEM],
        out_specs=out_spec,
        scratch_shapes=[pltpu.VMEM((B, H), jnp.float32),
                        pltpu.VMEM((B, H), jnp.float32)],
        compiler_params=pltpu.CompilerParams(
            dimension_semantics=("parallel", "arbitrary")),
        cost_estimate=pl.CostEstimate(flops=flops, transcendentals=2 * N,
                                      bytes_accessed=bytes_accessed),
    )(lam_arr, ts, ts1, w1, b1, w2, b2)

    emb0 = out[0]                                    # (N, D)
    emb_aug = out[1]                                 # (N, D)
    # encode(ts[order]) == encode(ts)[order] exactly: no third head needed.
    emb1 = jnp.take(emb0, order_arr, axis=0)
    return emb0, emb1, emb_aug, lam


def mixup_encode(ts_ncl, params):
    """Replicates MixingUpEncoder.encode / forward(is_augment=False)."""
    ts = jnp.asarray(ts_ncl, jnp.float32)            # (N, C, L)
    N, C, L = ts.shape
    w1, b1, w2, b2 = _prep_params(params)
    H, D = w2.shape

    B = _pick_block_n(N)
    TL = _pick_block_l(L)
    nb, lb = pl.cdiv(N, B), pl.cdiv(L, TL)

    x_spec = pl.BlockSpec((B, C, TL), lambda i, j: (i, 0, j))
    out_spec = pl.BlockSpec((B, D), lambda i, j: (i, 0))

    e = pl.pallas_call(
        _make_encode_kernel(L, TL, B, D),
        out_shape=jax.ShapeDtypeStruct((N, D), jnp.float32),
        grid=(nb, lb),
        in_specs=[x_spec, _VMEM, _VMEM, _VMEM, _VMEM],
        out_specs=out_spec,
        scratch_shapes=[pltpu.VMEM((B, H), jnp.float32)],
        compiler_params=pltpu.CompilerParams(
            dimension_semantics=("parallel", "arbitrary")),
    )(ts, w1, b1, w2, b2)
    return e


# ---------------------------------------------------------------------------
# Pure-JAX reference (for correctness check)
# ---------------------------------------------------------------------------

def _encode_ref(ts_ncl, params):
    w1, b1, w2, b2 = params
    h = jnp.maximum(jnp.einsum("ncl,ch->nlh", ts_ncl, w1) + b1[:, None, :], 0.0)
    pooled = jnp.mean(h, axis=1)
    e = pooled @ w2 + b2
    nrm = jnp.sqrt(jnp.sum(e * e, axis=-1, keepdims=True))
    return e / jnp.maximum(nrm, 1e-12)


# ---------------------------------------------------------------------------
# Main
# ---------------------------------------------------------------------------

if __name__ == "__main__":
    # Small shapes consistent with the module: ts is (N, C_in, L_in)
    N, C_IN, L = 2, 4, 16
    HIDDEN, OUT_DIM = 32, 32
    ALPHA = 1.0

    key = jax.random.PRNGKey(0)
    k_ts, k_w1, k_b1, k_w2, k_b2 = jax.random.split(key, 5)

    ts = jax.random.normal(k_ts, (N, C_IN, L), dtype=jnp.float32)

    # Deterministic synthetic encoder parameters.
    # TODO(synk): the PyTorch module wraps an arbitrary `encoder`; a fixed
    # conv1x1 -> ReLU -> mean-pool -> linear -> L2-normalize encoder is used.
    w1 = 0.1 * jax.random.normal(k_w1, (C_IN, HIDDEN), dtype=jnp.float32)
    b1 = 0.1 * jax.random.normal(k_b1, (1, HIDDEN), dtype=jnp.float32)
    w2 = 0.1 * jax.random.normal(k_w2, (HIDDEN, OUT_DIM), dtype=jnp.float32)
    b2 = 0.1 * jax.random.normal(k_b2, (1, OUT_DIM), dtype=jnp.float32)
    params = (w1, b1, w2, b2)

    # is_augment=True path (mixup + both encoder passes inside one kernel).
    rng = np.random.RandomState(0)
    emb0, emb1, emb_aug, lam = mixup_forward_augment(ts, params,
                                                     alpha=ALPHA, rng=rng)
    jax.block_until_ready((emb0, emb1, emb_aug))

    # is_augment=False path.
    emb_plain = mixup_encode(ts, params)
    jax.block_until_ready(emb_plain)

    # Reference check (host-side replay of the same RNG stream).
    rng_ref = np.random.RandomState(0)
    order = rng_ref.permutation(N)
    lam_ref = float(rng_ref.beta(ALPHA, ALPHA))
    ts1 = ts[jnp.asarray(order)]
    ts_aug = lam_ref * ts + (1.0 - lam_ref) * ts1

    np.testing.assert_allclose(np.asarray(emb0),
                               np.asarray(_encode_ref(ts, params)),
                               rtol=1e-2, atol=1e-3)
    np.testing.assert_allclose(np.asarray(emb1),
                               np.asarray(_encode_ref(ts1, params)),
                               rtol=1e-2, atol=1e-3)
    np.testing.assert_allclose(np.asarray(emb_aug),
                               np.asarray(_encode_ref(ts_aug, params)),
                               rtol=1e-2, atol=1e-3)
    np.testing.assert_allclose(np.asarray(emb_plain),
                               np.asarray(_encode_ref(ts, params)),
                               rtol=1e-2, atol=1e-3)
    assert abs(lam - lam_ref) < 1e-12

    print("KERNEL_OK")
</pallas_src>

<mosaic_0001>
module attributes {stable_mosaic.version = 11 : i64} {
  func.func @kernel(%arg0: i32, %arg1: i32, %arg2: memref<1xf32, #tpu.memory_space<smem>>, %arg3: memref<2x4x16xf32, #tpu.memory_space<vmem>>, %arg4: memref<2x4x16xf32, #tpu.memory_space<vmem>>, %arg5: memref<4x32xf32, #tpu.memory_space<vmem>>, %arg6: memref<32x1xf32, #tpu.memory_space<vmem>>, %arg7: memref<32x32xf32, #tpu.memory_space<vmem>>, %arg8: memref<1x32xf32, #tpu.memory_space<vmem>>, %arg9: memref<2x2x32xf32, #tpu.memory_space<vmem>>, %arg10: memref<2x32xf32, #tpu.memory_space<vmem>>, %arg11: memref<2x32xf32, #tpu.memory_space<vmem>>) attributes {dimension_semantics = [#tpu.dimension_semantics<parallel>, #tpu.dimension_semantics<arbitrary>], iteration_bounds = array<i64: 1, 1>, scalar_prefetch = 0 : i64, scratch_operands = 2 : i64, tpu.core_type = #tpu.core_type<tc>, window_params = [{transform_indices = @transform_0, window_bounds = array<i64: 1>}, {transform_indices = @transform_1, window_bounds = array<i64: 2, 4, 16>}, {transform_indices = @transform_2, window_bounds = array<i64: 2, 4, 16>}, {pipeline_mode = #tpu.pipeline_mode<synchronous>, transform_indices = @transform_3, window_bounds = array<i64: 4, 32>}, {pipeline_mode = #tpu.pipeline_mode<synchronous>, transform_indices = @transform_4, window_bounds = array<i64: 32, 1>}, {pipeline_mode = #tpu.pipeline_mode<synchronous>, transform_indices = @transform_5, window_bounds = array<i64: 32, 32>}, {pipeline_mode = #tpu.pipeline_mode<synchronous>, transform_indices = @transform_6, window_bounds = array<i64: 1, 32>}, {transform_indices = @transform_7, window_bounds = array<i64: 2, 2, 32>}]} {
    %c0_i32 = arith.constant 0 : i32
    %0 = arith.cmpi eq, %arg1, %c0_i32 : i32
    %1 = arith.extui %0 : i1 to i32
    %c0_i32_0 = arith.constant 0 : i32
    %2 = arith.cmpi ne, %1, %c0_i32_0 : i32
    scf.if %2 {
      %cst_24 = arith.constant 0.000000e+00 : f32
      %87 = vector.broadcast %cst_24 : f32 to vector<2x32xf32>
      %c0_25 = arith.constant 0 : index
      %c0_26 = arith.constant 0 : index
      %88 = vector.load %arg10[%c0_25, %c0_26] : memref<2x32xf32, #tpu.memory_space<vmem>>, vector<2x32xf32>
      tpu.vector_store %arg10[%c0_25, %c0_26], %87 {strides = array<i32>} : memref<2x32xf32, #tpu.memory_space<vmem>>, vector<2x32xf32>,
      %cst_27 = arith.constant 0.000000e+00 : f32
      %89 = vector.broadcast %cst_27 : f32 to vector<2x32xf32>
      %c0_28 = arith.constant 0 : index
      %c0_29 = arith.constant 0 : index
      %90 = vector.load %arg11[%c0_28, %c0_29] : memref<2x32xf32, #tpu.memory_space<vmem>>, vector<2x32xf32>
      tpu.vector_store %arg11[%c0_28, %c0_29], %89 {strides = array<i32>} : memref<2x32xf32, #tpu.memory_space<vmem>>, vector<2x32xf32>,
    } else {
    }
    %c0 = arith.constant 0 : index
    %3 = memref.load %arg2[%c0] : memref<1xf32, #tpu.memory_space<smem>>
    %c0_1 = arith.constant 0 : index
    %c0_2 = arith.constant 0 : index
    %4 = vector.load %arg5[%c0_1, %c0_2] : memref<4x32xf32, #tpu.memory_space<vmem>>, vector<4x32xf32>
    %c0_3 = arith.constant 0 : index
    %c0_4 = arith.constant 0 : index
    %5 = vector.load %arg6[%c0_3, %c0_4] : memref<32x1xf32, #tpu.memory_space<vmem>>, vector<32x1xf32>
    %c0_5 = arith.constant 0 : index
    %c0_6 = arith.constant 0 : index
    %c0_7 = arith.constant 0 : index
    %6 = vector.load %arg3[%c0_5, %c0_6, %c0_7] : memref<2x4x16xf32, #tpu.memory_space<vmem>>, vector<2x4x16xf32>
    %7 = vector.extract_strided_slice %6 {offsets = [0, 0, 0], sizes = [2, 1, 16], strides = [1, 1, 1]} : vector<2x4x16xf32> to vector<2x1x16xf32>
    %8 = vector.extract_strided_slice %4 {offsets = [0, 0], sizes = [1, 32], strides = [1, 1]} : vector<4x32xf32> to vector<1x32xf32>
    %9 = vector.shape_cast %8 : vector<1x32xf32> to vector<1x32x1xf32>
    %10 = vector.broadcast %7 : vector<2x1x16xf32> to vector<2x32x16xf32>
    %11 = vector.broadcast %9 : vector<1x32x1xf32> to vector<2x32x16xf32>
    %12 = arith.mulf %10, %11 : vector<2x32x16xf32>
    %13 = vector.shape_cast %5 : vector<32x1xf32> to vector<1x32x1xf32>
    %14 = vector.broadcast %13 : vector<1x32x1xf32> to vector<2x32x16xf32>
    %15 = arith.addf %12, %14 : vector<2x32x16xf32>
    %16 = vector.extract_strided_slice %6 {offsets = [0, 1, 0], sizes = [2, 1, 16], strides = [1, 1, 1]} : vector<2x4x16xf32> to vector<2x1x16xf32>
    %17 = vector.extract_strided_slice %4 {offsets = [1, 0], sizes = [1, 32], strides = [1, 1]} : vector<4x32xf32> to vector<1x32xf32>
    %18 = vector.shape_cast %17 : vector<1x32xf32> to vector<1x32x1xf32>
    %19 = vector.broadcast %16 : vector<2x1x16xf32> to vector<2x32x16xf32>
    %20 = vector.broadcast %18 : vector<1x32x1xf32> to vector<2x32x16xf32>
    %21 = arith.mulf %19, %20 : vector<2x32x16xf32>
    %22 = arith.addf %15, %21 : vector<2x32x16xf32>
    %23 = vector.extract_strided_slice %6 {offsets = [0, 2, 0], sizes = [2, 1, 16], strides = [1, 1, 1]} : vector<2x4x16xf32> to vector<2x1x16xf32>
    %24 = vector.extract_strided_slice %4 {offsets = [2, 0], sizes = [1, 32], strides = [1, 1]} : vector<4x32xf32> to vector<1x32xf32>
    %25 = vector.shape_cast %24 : vector<1x32xf32> to vector<1x32x1xf32>
    %26 = vector.broadcast %23 : vector<2x1x16xf32> to vector<2x32x16xf32>
    %27 = vector.broadcast %25 : vector<1x32x1xf32> to vector<2x32x16xf32>
    %28 = arith.mulf %26, %27 : vector<2x32x16xf32>
    %29 = arith.addf %22, %28 : vector<2x32x16xf32>
    %30 = vector.extract_strided_slice %6 {offsets = [0, 3, 0], sizes = [2, 1, 16], strides = [1, 1, 1]} : vector<2x4x16xf32> to vector<2x1x16xf32>
    %31 = vector.extract_strided_slice %4 {offsets = [3, 0], sizes = [1, 32], strides = [1, 1]} : vector<4x32xf32> to vector<1x32xf32>
    %32 = vector.shape_cast %31 : vector<1x32xf32> to vector<1x32x1xf32>
    %33 = vector.broadcast %30 : vector<2x1x16xf32> to vector<2x32x16xf32>
    %34 = vector.broadcast %32 : vector<1x32x1xf32> to vector<2x32x16xf32>
    %35 = arith.mulf %33, %34 : vector<2x32x16xf32>
    %36 = arith.addf %29, %35 : vector<2x32x16xf32>
    %c0_8 = arith.constant 0 : index
    %c0_9 = arith.constant 0 : index
    %c0_10 = arith.constant 0 : index
    %37 = vector.load %arg4[%c0_8, %c0_9, %c0_10] : memref<2x4x16xf32, #tpu.memory_space<vmem>>, vector<2x4x16xf32>
    %38 = vector.extract_strided_slice %37 {offsets = [0, 0, 0], sizes = [2, 1, 16], strides = [1, 1, 1]} : vector<2x4x16xf32> to vector<2x1x16xf32>
    %39 = vector.extract_strided_slice %4 {offsets = [0, 0], sizes = [1, 32], strides = [1, 1]} : vector<4x32xf32> to vector<1x32xf32>
    %40 = vector.shape_cast %39 : vector<1x32xf32> to vector<1x32x1xf32>
    %41 = vector.broadcast %38 : vector<2x1x16xf32> to vector<2x32x16xf32>
    %42 = vector.broadcast %40 : vector<1x32x1xf32> to vector<2x32x16xf32>
    %43 = arith.mulf %41, %42 : vector<2x32x16xf32>
    %44 = vector.shape_cast %5 : vector<32x1xf32> to vector<1x32x1xf32>
    %45 = vector.broadcast %44 : vector<1x32x1xf32> to vector<2x32x16xf32>
    %46 = arith.addf %43, %45 : vector<2x32x16xf32>
    %47 = vector.extract_strided_slice %37 {offsets = [0, 1, 0], sizes = [2, 1, 16], strides = [1, 1, 1]} : vector<2x4x16xf32> to vector<2x1x16xf32>
    %48 = vector.extract_strided_slice %4 {offsets = [1, 0], sizes = [1, 32], strides = [1, 1]} : vector<4x32xf32> to vector<1x32xf32>
    %49 = vector.shape_cast %48 : vector<1x32xf32> to vector<1x32x1xf32>
    %50 = vector.broadcast %47 : vector<2x1x16xf32> to vector<2x32x16xf32>
    %51 = vector.broadcast %49 : vector<1x32x1xf32> to vector<2x32x16xf32>
    %52 = arith.mulf %50, %51 : vector<2x32x16xf32>
    %53 = arith.addf %46, %52 : vector<2x32x16xf32>
    %54 = vector.extract_strided_slice %37 {offsets = [0, 2, 0], sizes = [2, 1, 16], strides = [1, 1, 1]} : vector<2x4x16xf32> to vector<2x1x16xf32>
    %55 = vector.extract_strided_slice %4 {offsets = [2, 0], sizes = [1, 32], strides = [1, 1]} : vector<4x32xf32> to vector<1x32xf32>
    %56 = vector.shape_cast %55 : vector<1x32xf32> to vector<1x32x1xf32>
    %57 = vector.broadcast %54 : vector<2x1x16xf32> to vector<2x32x16xf32>
    %58 = vector.broadcast %56 : vector<1x32x1xf32> to vector<2x32x16xf32>
    %59 = arith.mulf %57, %58 : vector<2x32x16xf32>
    %60 = arith.addf %53, %59 : vector<2x32x16xf32>
    %61 = vector.extract_strided_slice %37 {offsets = [0, 3, 0], sizes = [2, 1, 16], strides = [1, 1, 1]} : vector<2x4x16xf32> to vector<2x1x16xf32>
    %62 = vector.extract_strided_slice %4 {offsets = [3, 0], sizes = [1, 32], strides = [1, 1]} : vector<4x32xf32> to vector<1x32xf32>
    %63 = vector.shape_cast %62 : vector<1x32xf32> to vector<1x32x1xf32>
    %64 = vector.broadcast %61 : vector<2x1x16xf32> to vector<2x32x16xf32>
    %65 = vector.broadcast %63 : vector<1x32x1xf32> to vector<2x32x16xf32>
    %66 = arith.mulf %64, %65 : vector<2x32x16xf32>
    %67 = arith.addf %60, %66 : vector<2x32x16xf32>
    %68 = arith.subf %36, %67 : vector<2x32x16xf32>
    %69 = vector.broadcast %3 : f32 to vector<2x32x16xf32>
    %70 = arith.mulf %69, %68 : vector<2x32x16xf32>
    %71 = arith.addf %67, %70 : vector<2x32x16xf32>
    %cst = arith.constant 0.000000e+00 : f32
    %72 = vector.broadcast %cst : f32 to vector<2x32x16xf32>
    %73 = arith.maximumf %36, %72 : vector<2x32x16xf32>
    %cst_11 = arith.constant 0.000000e+00 : f32
    %74 = vector.broadcast %cst_11 : f32 to vector<2x32x16xf32>
    %75 = arith.maximumf %71, %74 : vector<2x32x16xf32>
    %c0_12 = arith.constant 0 : index
    %c0_13 = arith.constant 0 : index
    %76 = vector.load %arg10[%c0_12, %c0_13] : memref<2x32xf32, #tpu.memory_space<vmem>>, vector<2x32xf32>
    %cst_14 = arith.constant dense<0.000000e+00> : vector<2x32xf32>
    %77 = vector.multi_reduction <add>, %73, %cst_14 [2] : vector<2x32x16xf32> to vector<2x32xf32>
    %78 = arith.addf %76, %77 : vector<2x32xf32>
    %c0_15 = arith.constant 0 : index
    %c0_16 = arith.constant 0 : index
    %79 = vector.load %arg10[%c0_15, %c0_16] : memref<2x32xf32, #tpu.memory_space<vmem>>, vector<2x32xf32>
    tpu.vector_store %arg10[%c0_15, %c0_16], %78 {strides = array<i32>} : memref<2x32xf32, #tpu.memory_space<vmem>>, vector<2x32xf32>,
    %c0_17 = arith.constant 0 : index
    %c0_18 = arith.constant 0 : index
    %80 = vector.load %arg11[%c0_17, %c0_18] : memref<2x32xf32, #tpu.memory_space<vmem>>, vector<2x32xf32>
    %cst_19 = arith.constant dense<0.000000e+00> : vector<2x32xf32>
    %81 = vector.multi_reduction <add>, %75, %cst_19 [2] : vector<2x32x16xf32> to vector<2x32xf32>
    %82 = arith.addf %80, %81 : vector<2x32xf32>
    %c0_20 = arith.constant 0 : index
    %c0_21 = arith.constant 0 : index
    %83 = vector.load %arg11[%c0_20, %c0_21] : memref<2x32xf32, #tpu.memory_space<vmem>>, vector<2x32xf32>
    tpu.vector_store %arg11[%c0_20, %c0_21], %82 {strides = array<i32>} : memref<2x32xf32, #tpu.memory_space<vmem>>, vector<2x32xf32>,
    %c0_i32_22 = arith.constant 0 : i32
    %84 = arith.cmpi eq, %arg1, %c0_i32_22 : i32
    %85 = arith.extui %84 : i1 to i32
    %c0_i32_23 = arith.constant 0 : i32
    %86 = arith.cmpi ne, %85, %c0_i32_23 : i32
    scf.if %86 {
      %c0_24 = arith.constant 0 : index
      %c0_25 = arith.constant 0 : index
      %87 = vector.load %arg10[%c0_24, %c0_25] : memref<2x32xf32, #tpu.memory_space<vmem>>, vector<2x32xf32>
      %c0_26 = arith.constant 0 : index
      %c0_27 = arith.constant 0 : index
      %88 = vector.load %arg11[%c0_26, %c0_27] : memref<2x32xf32, #tpu.memory_space<vmem>>, vector<2x32xf32>
      %89 = tpu.concatenate %87, %88 in 0 : vector<2x32xf32>, vector<2x32xf32> -> vector<4x32xf32>
      %cst_28 = arith.constant 6.250000e-02 : f32
      %90 = vector.broadcast %cst_28 : f32 to vector<4x32xf32>
      %91 = arith.mulf %89, %90 : vector<4x32xf32>
      %c0_29 = arith.constant 0 : index
      %c0_30 = arith.constant 0 : index
      %92 = vector.load %arg7[%c0_29, %c0_30] : memref<32x32xf32, #tpu.memory_space<vmem>>, vector<32x32xf32>
      %cst_31 = arith.constant dense<0.000000e+00> : vector<4x32xf32>
      %93 = tpu.matmul %91, %92, %cst_31 {dimension_numbers = #tpu.dot_dimension_numbers<[1], [0], [0], [1], [0, 0, 1, 1], [], []>} : vector<4x32xf32>, vector<32x32xf32>, vector<4x32xf32> -> vector<4x32xf32>
      %c0_32 = arith.constant 0 : index
      %c0_33 = arith.constant 0 : index
      %94 = vector.load %arg8[%c0_32, %c0_33] : memref<1x32xf32, #tpu.memory_space<vmem>>, vector<1x32xf32>
      %95 = vector.broadcast %94 : vector<1x32xf32> to vector<4x32xf32>
      %96 = arith.addf %93, %95 : vector<4x32xf32>
      %97 = arith.mulf %96, %96 : vector<4x32xf32>
      %cst_34 = arith.constant dense<0.000000e+00> : vector<4xf32>
      %98 = vector.multi_reduction <add>, %97, %cst_34 [1] : vector<4x32xf32> to vector<4xf32>
      %99 = vector.shape_cast %98 : vector<4xf32> to vector<4x1xf32>
      %cst_35 = arith.constant 1.000000e-24 : f32
      %100 = vector.broadcast %cst_35 : f32 to vector<4x1xf32>
      %101 = arith.maximumf %99, %100 : vector<4x1xf32>
      %102 = math.rsqrt %101 : vector<4x1xf32>
      %103 = vector.broadcast %102 : vector<4x1xf32> to vector<4x32xf32>
      %104 = arith.mulf %96, %103 : vector<4x32xf32>
      %105 = vector.shape_cast %104 : vector<4x32xf32> to vector<2x2x32xf32>
      %c0_36 = arith.constant 0 : index
      %c0_37 = arith.constant 0 : index
      %c0_38 = arith.constant 0 : index
      %106 = vector.load %arg9[%c0_36, %c0_37, %c0_38] : memref<2x2x32xf32, #tpu.memory_space<vmem>>, vector<2x2x32xf32>
      tpu.vector_store %arg9[%c0_36, %c0_37, %c0_38], %105 {strides = array<i32>} : memref<2x2x32xf32, #tpu.memory_space<vmem>>, vector<2x2x32xf32>,
    } else {
    }
    return
  }
  func.func @transform_0(%arg0: i32, %arg1: i32) -> i32 {
    %c0_i32 = arith.constant 0 : i32
    %c0_i32_0 = arith.constant 0 : i32
    return %c0_i32 : i32
  }
  func.func @transform_1(%arg0: i32, %arg1: i32) -> (i32, i32, i32) {
    %c0_i32 = arith.constant 0 : i32
    %c0_i32_0 = arith.constant 0 : i32
    return %arg0, %c0_i32, %arg1 : i32, i32, i32
  }
  func.func @transform_2(%arg0: i32, %arg1: i32) -> (i32, i32, i32) {
    %c0_i32 = arith.constant 0 : i32
    %c0_i32_0 = arith.constant 0 : i32
    return %arg0, %c0_i32, %arg1 : i32, i32, i32
  }
  func.func @transform_3(%arg0: i32, %arg1: i32) -> (i32, i32) {
    %c0_i32 = arith.constant 0 : i32
    %c0_i32_0 = arith.constant 0 : i32
    %c0_i32_1 = arith.constant 0 : i32
    return %c0_i32, %c0_i32_0 : i32, i32
  }
  func.func @transform_4(%arg0: i32, %arg1: i32) -> (i32, i32) {
    %c0_i32 = arith.constant 0 : i32
    %c0_i32_0 = arith.constant 0 : i32
    %c0_i32_1 = arith.constant 0 : i32
    return %c0_i32, %c0_i32_0 : i32, i32
  }
  func.func @transform_5(%arg0: i32, %arg1: i32) -> (i32, i32) {
    %c0_i32 = arith.constant 0 : i32
    %c0_i32_0 = arith.constant 0 : i32
    %c0_i32_1 = arith.constant 0 : i32
    return %c0_i32, %c0_i32_0 : i32, i32
  }
  func.func @transform_6(%arg0: i32, %arg1: i32) -> (i32, i32) {
    %c0_i32 = arith.constant 0 : i32
    %c0_i32_0 = arith.constant 0 : i32
    %c0_i32_1 = arith.constant 0 : i32
    return %c0_i32, %c0_i32_0 : i32, i32
  }
  func.func @transform_7(%arg0: i32, %arg1: i32) -> (i32, i32, i32) {
    %c0_i32 = arith.constant 0 : i32
    %c0_i32_0 = arith.constant 0 : i32
    %c0_i32_1 = arith.constant 0 : i32
    return %c0_i32, %arg0, %c0_i32_0 : i32, i32, i32
  }
}

</mosaic_0001>

<bundles_post_ra>
// kernel: tpu_custom_call.1
= control target key start
LH: loop header
LB: loop body
LE: loop exit
PB: predicated region body
PF: predicated region fallthrough
CT: control target
= control target key end

     0   :  { %13 = vsyncpa [#allocation6], 0  ;;  %s1033_s0 = inlined_call_operand.<no memory space> [shape: f32[1], index: 0, kind: input, shape index: {}]   ;;  %s1034_s1 = inlined_call_operand.vmem [shape: f32[2,4,16], index: 1, kind: input, shape index: {}]   ;;  %s1035_s2 = inlined_call_operand.hbm [shape: f32[2,4,16], index: 2, kind: input, shape index: {}]   ;;  %s1036_s3 = inlined_call_operand.hbm [shape: f32[4,32], index: 3, kind: input, shape index: {}]   ;;  %s1037_s4 = inlined_call_operand.vmem [shape: f32[32,1], index: 4, kind: input, shape index: {}]   ;;  %s1038_s5 = inlined_call_operand.vmem [shape: f32[32,32], index: 5, kind: input, shape index: {}]   ;;  %s1039_s6 = inlined_call_operand.vmem [shape: f32[1,32], index: 6, kind: input, shape index: {}]   ;;  %s1040_s7 = inlined_call_operand.hbm [shape: f32[2,2,32], index: 7, kind: output, shape index: {}]  }
   0x1   :  { %14 = vsyncpa [#allocation9], 0 }
   0x2   :  { %15 = vsyncpa [#allocation7], 0  ;;  %s795_s24 = smov [#allocation5]  }
   0x3   :  { %s25_s25 = sshll.u32 %s795_s24, 4  ;;  %s26_s25 = int_to_ptr.vmem [resolvable:$true] %s25_s25 }
   0x4   :  { %s737_s26 = scalar_lea.vmem %s26_s25, 128  ;;  %p742_p1 = scmp.lt.s32.totalorder %s26_s25, %s26_s25 }
   0x5   :  { %p738_p0 = scmp.ne.s32.totalorder %s26_s25, %s737_s26  ;;  %p743_p2 = scmp.lt.s32.totalorder %s737_s26, %s737_s26 }
   0x7   :  { %p744_p3 = por %p743_p2, %p742_p1 }
   0x9   :  { %p745_p4 = pnand %p744_p3, %p738_p0 }
   0xb   :  { %748 = shalt.err (!%p745_p4)
}
   0xc   :  { %s796_s27 = smov 64   ;;  %s797_s28 = smov 4  }
   0xd   :  { %31 = dma.hbm_to_vmem [thread:$0]  %s1035_s2, 128, %s26_s25, [#allocation6], %s796_s27, %s796_s27, %s797_s28  }
   0xe   :  { %s798_s8 = smov [#allocation8]  }
   0xf   :  { %s38_s9 = sshll.u32 %s798_s8, 4  ;;  %s39_s9 = int_to_ptr.vmem [resolvable:$true] %s38_s9 }
  0x10   :  { %s757_s10 = scalar_lea.vmem %s39_s9, 64  ;;  %p762_p6 = scmp.lt.s32.totalorder %s39_s9, %s39_s9 }
  0x11   :  { %p758_p5 = scmp.ne.s32.totalorder %s39_s9, %s757_s10  ;;  %p763_p7 = scmp.lt.s32.totalorder %s757_s10, %s757_s10 }
  0x13   :  { %p764_p8 = por %p763_p7, %p762_p6 }
  0x15   :  { %p765_p9 = pnand %p764_p8, %p758_p5 }
  0x17   :  { %768 = shalt.err (!%p765_p9)
}
  0x18   :  { %41 = dma.hbm_to_vmem [thread:$0]  %s1036_s3, 64, %s39_s9, [#allocation9]  }
  0x19   :  { %789 = dma.done.wait [#allocation6], 128  }
  0x1a   :  { %790 = vsyncadd [#allocation6], 4294967168 }
  0x1b   :  { %791 = dma.done.wait [#allocation9], 64  }
  0x1c   :  { %792 = vsyncadd [#allocation9], 4294967232  ;;  %v69_v0 = vlaneseq  ;;  %v799_v1 = vmov 0   ;;  %v65_v3 = vld [vmem:[%s1037_s4 + $0x10] sm:$0xff]  ;;  %v63_v4 = vld [vmem:[%s1037_s4] sm:$0xff]  ;;  %vm401_vm0 = vcmask 130048  }
  0x1d   :  { %726 = vset.pattern.permute.xlu1 %v799_v1  ;;  %725 = vset.pattern.permute.xlu0 %v799_v1  ;;  %v66_v6 = vld [vmem:[%s1037_s4 + $0x18] sm:$0xff]  ;;  %v64_v7 = vld [vmem:[%s1037_s4 + $0x8] sm:$0xff]  ;;  %v67_v18 = vld [vmem:[%s1034_s1] sm:$0xf]  ;;  %vm58_vm1 = vcmask 254976   ;;  %vm801_vm2 = vmmov 0  }
  0x1e   :  { %v853_v2 = vshrl.u32 %v69_v0, 7  ;;  %116 = vperm.xlu1 %726, %v65_v3   ;;  %106 = vperm.xlu0 %725, %v63_v4   ;;  %v62_v8 = vld [vmem:[#allocation8] sm:$0xf]  ;;  %v68_v19 = vld [vmem:[%s1034_s1 + $0x4] sm:$0xf]  ;;  %vm445_vm3 = vcmask 130112  }
  0x1f   :  { %v261_v20 = vld [vmem:[#allocation5] sm:$0xf]  ;;  %v262_v21 = vld [vmem:[#allocation5 + $0x4] sm:$0xf]  ;;  %vm452_vm4 = vcmask 195712   ;;  %vm459_vm5 = vcmask 261312  }
  0x20   :  { %v71_v5 = vsub.s32 0, %v853_v2  ;;  %v134_v10 = vsub.s32 1, %v853_v2  ;;  %v177_v12 = vsub.s32 2, %v853_v2  ;;  %v220_v14 = vsub.s32 3, %v853_v2  ;;  %s803_s8 = smov [#allocation10]  }
  0x21   :  { %vm480_vm6 = vcmask 1041409   ;;  %vm569_vm7 = vcmask 1041408   ;;  %vm583_vm8 = vcmask 261120   ;;  %vm658_vm9 = vcmask 257024   ;;  %s683_s9 = sshll.u32 %s803_s8, 4  ;;  %s684_s9 = int_to_ptr.vmem [resolvable:$true] %s683_s9 }
  0x22   :  { %121 = vperm.xlu1 %726, %v66_v6   ;;  %111 = vperm.xlu0 %725, %v64_v7   ;;  %v72_v9 = vrot.slane %v62_v8, %v71_v5  ;;  %v135_v11 = vrot.slane %v62_v8, %v134_v10  ;;  %v178_v13 = vrot.slane %v62_v8, %v177_v12  ;;  %p774_p11 = scmp.lt.s32.totalorder %s684_s9, %s684_s9 }
  0x23   :  { %v221_v15 = vrot.slane %v62_v8, %v220_v14  ;;  %v91_v24 = vrot.slane %v67_v18, %v71_v5  ;;  %v95_v25 = vrot.slane %v68_v19, %v71_v5  ;;  %v266_v26 = vrot.slane %v261_v20, %v71_v5 }
  0x24   :  { %v270_v27 = vrot.slane %v262_v21, %v71_v5  ;;  %v877_v28 = vrot.slane %v67_v18, %v134_v10  ;;  %v879_v29 = vrot.slane %v68_v19, %v134_v10  ;;  %v881_v30 = vrot.slane %v261_v20, %v134_v10 }
  0x25   :  { %v883_v31 = vrot.slane %v262_v21, %v134_v10  ;;  %v885_v32 = vrot.slane %v67_v18, %v177_v12  ;;  %v887_v33 = vrot.slane %v68_v19, %v177_v12  ;;  %v889_v34 = vrot.slane %v261_v20, %v177_v12 }
  0x26   :  { %78 = vbcast.lane.b32.xlu1 %v72_v9, 264  ;;  %74 = vbcast.lane.b32.xlu0 %v72_v9, 256  ;;  %v891_v35 = vrot.slane %v262_v21, %v177_v12  ;;  %v893_v38 = vrot.slane %v67_v18, %v220_v14  ;;  %v895_v39 = vrot.slane %v68_v19, %v220_v14 }
  0x27   :  { %v897_v40 = vrot.slane %v261_v20, %v220_v14  ;;  %v899_v41 = vrot.slane %v262_v21, %v220_v14 }
  0x2a   :  { %86 = vbcast.lane.b32.xlu1 %v72_v9, 280  ;;  %82 = vbcast.lane.b32.xlu0 %v72_v9, 272 }
  0x2e   :  { %141 = vbcast.lane.b32.xlu1 %v135_v11, 264  ;;  %137 = vbcast.lane.b32.xlu0 %v135_v11, 256 }
  0x32   :  { %149 = vbcast.lane.b32.xlu1 %v135_v11, 280  ;;  %145 = vbcast.lane.b32.xlu0 %v135_v11, 272 }
  0x36   :  { %184 = vbcast.lane.b32.xlu1 %v178_v13, 264  ;;  %180 = vbcast.lane.b32.xlu0 %v178_v13, 256 }
  0x3a   :  { %192 = vbcast.lane.b32.xlu1 %v178_v13, 280  ;;  %188 = vbcast.lane.b32.xlu0 %v178_v13, 272 }
  0x3e   :  { %227 = vbcast.lane.b32.xlu1 %v221_v15, 264  ;;  %223 = vbcast.lane.b32.xlu0 %v221_v15, 256 }
  0x42   :  { %235 = vbcast.lane.b32.xlu1 %v221_v15, 280  ;;  %231 = vbcast.lane.b32.xlu0 %v221_v15, 272 }
  0x99   :  { %v117_v16 = vpop.permute.xlu1 %116  ;;  %v107_v17 = vpop.permute.xlu0 %106 }
  0x9d   :  { %v122_v22 = vpop.permute.xlu1 %121  ;;  %v112_v23 = vpop.permute.xlu0 %111 }
  0xa1   :  { %v79_v36 = vpop.permute.xlu1 %78  ;;  %v75_v37 = vpop.permute.xlu0 %74 }
  0xa2   :  { %v97_v42 = vmul.f32 %v91_v24, %v79_v36  ;;  %v101_v43 = vmul.f32 %v95_v25, %v79_v36  ;;  %v272_v44 = vmul.f32 %v266_v26, %v79_v36  ;;  %v276_v45 = vmul.f32 %v270_v27, %v79_v36 }
  0xa3   :  { %v96_v46 = vmul.f32 %v91_v24, %v75_v37  ;;  %v100_v47 = vmul.f32 %v95_v25, %v75_v37  ;;  %v271_v48 = vmul.f32 %v266_v26, %v75_v37  ;;  %v275_v49 = vmul.f32 %v270_v27, %v75_v37 }
  0xa4   :  { %v125_v50 = vadd.f32 %v112_v23, %v97_v42  ;;  %v129_v51 = vadd.f32 %v112_v23, %v101_v43  ;;  %v280_v52 = vadd.f32 %v272_v44, %v112_v23  ;;  %v284_v53 = vadd.f32 %v276_v45, %v112_v23 }
  0xa5   :  { %v124_v54 = vadd.f32 %v107_v17, %v96_v46  ;;  %v128_v55 = vadd.f32 %v107_v17, %v100_v47  ;;  %v279_v56 = vadd.f32 %v271_v48, %v107_v17  ;;  %v283_v57 = vadd.f32 %v275_v49, %v107_v17  ;;  %v87_v58 = vpop.permute.xlu1 %86  ;;  %v83_v59 = vpop.permute.xlu0 %82 }
  0xa6   :  { %v99_v60 = vmul.f32 %v91_v24, %v87_v58  ;;  %v103_v61 = vmul.f32 %v95_v25, %v87_v58  ;;  %v274_v62 = vmul.f32 %v266_v26, %v87_v58  ;;  %v278_v63 = vmul.f32 %v270_v27, %v87_v58 }
  0xa7   :  { %v98_v1 = vmul.f32 %v91_v24, %v83_v59  ;;  %v102_v3 = vmul.f32 %v95_v25, %v83_v59  ;;  %v273_v4 = vmul.f32 %v266_v26, %v83_v59  ;;  %v277_v5 = vmul.f32 %v270_v27, %v83_v59 }
  0xa8   :  { %v127_v6 = vadd.f32 %v122_v22, %v99_v60  ;;  %v131_v7 = vadd.f32 %v122_v22, %v103_v61  ;;  %v282_v8 = vadd.f32 %v274_v62, %v122_v22  ;;  %v286_v9 = vadd.f32 %v278_v63, %v122_v22 }
  0xa9   :  { %v126_v10 = vadd.f32 %v117_v16, %v98_v1  ;;  %v130_v11 = vadd.f32 %v117_v16, %v102_v3  ;;  %v281_v12 = vadd.f32 %v273_v4, %v117_v16  ;;  %v285_v13 = vadd.f32 %v277_v5, %v117_v16  ;;  %v142_v14 = vpop.permute.xlu1 %141  ;;  %v138_v15 = vpop.permute.xlu0 %137 }
  0xaa   :  { %v160_v17 = vmul.f32 %v877_v28, %v142_v14  ;;  %v164_v18 = vmul.f32 %v879_v29, %v142_v14  ;;  %v296_v19 = vmul.f32 %v881_v30, %v142_v14  ;;  %v300_v20 = vmul.f32 %v883_v31, %v142_v14 }
  0xab   :  { %v159_v21 = vmul.f32 %v877_v28, %v138_v15  ;;  %v163_v23 = vmul.f32 %v879_v29, %v138_v15  ;;  %v295_v22 = vmul.f32 %v881_v30, %v138_v15  ;;  %v299_v24 = vmul.f32 %v883_v31, %v138_v15 }
  0xac   :  { %v168_v25 = vadd.f32 %v160_v17, %v125_v50  ;;  %v172_v16 = vadd.f32 %v164_v18, %v129_v51  ;;  %v304_v26 = vadd.f32 %v296_v19, %v280_v52  ;;  %v308_v27 = vadd.f32 %v300_v20, %v284_v53 }
  0xad   :  { %v167_v36 = vadd.f32 %v159_v21, %v124_v54  ;;  %v171_v37 = vadd.f32 %v163_v23, %v128_v55  ;;  %v303_v42 = vadd.f32 %v295_v22, %v279_v56  ;;  %v307_v43 = vadd.f32 %v299_v24, %v283_v57  ;;  %v150_v44 = vpop.permute.xlu1 %149  ;;  %v146_v45 = vpop.permute.xlu0 %145 }
  0xae   :  { %v162_v46 = vmul.f32 %v877_v28, %v150_v44  ;;  %v166_v47 = vmul.f32 %v879_v29, %v150_v44  ;;  %v298_v48 = vmul.f32 %v881_v30, %v150_v44  ;;  %v302_v49 = vmul.f32 %v883_v31, %v150_v44 }
  0xaf   :  { %v161_v58 = vmul.f32 %v877_v28, %v146_v45  ;;  %v165_v50 = vmul.f32 %v879_v29, %v146_v45  ;;  %v297_v51 = vmul.f32 %v881_v30, %v146_v45  ;;  %v301_v52 = vmul.f32 %v883_v31, %v146_v45 }
  0xb0   :  { %v170_v53 = vadd.f32 %v162_v46, %v127_v6  ;;  %v174_v54 = vadd.f32 %v166_v47, %v131_v7  ;;  %v306_v55 = vadd.f32 %v298_v48, %v282_v8  ;;  %v310_v56 = vadd.f32 %v302_v49, %v286_v9 }
  0xb1   :  { %v169_v57 = vadd.f32 %v161_v58, %v126_v10  ;;  %v173_v59 = vadd.f32 %v165_v50, %v130_v11  ;;  %v305_v60 = vadd.f32 %v297_v51, %v281_v12  ;;  %v309_v61 = vadd.f32 %v301_v52, %v285_v13  ;;  %v185_v62 = vpop.permute.xlu1 %184  ;;  %v181_v63 = vpop.permute.xlu0 %180 }
  0xb2   :  { %v203_v1 = vmul.f32 %v885_v32, %v185_v62  ;;  %v207_v28 = vmul.f32 %v887_v33, %v185_v62  ;;  %v320_v29 = vmul.f32 %v889_v34, %v185_v62  ;;  %v324_v30 = vmul.f32 %v891_v35, %v185_v62 }
  0xb3   :  { %v202_v31 = vmul.f32 %v885_v32, %v181_v63  ;;  %v206_v3 = vmul.f32 %v887_v33, %v181_v63  ;;  %v319_v4 = vmul.f32 %v889_v34, %v181_v63  ;;  %v323_v5 = vmul.f32 %v891_v35, %v181_v63 }
  0xb4   :  { %v211_v6 = vadd.f32 %v203_v1, %v168_v25  ;;  %v215_v7 = vadd.f32 %v207_v28, %v172_v16  ;;  %v328_v8 = vadd.f32 %v320_v29, %v304_v26  ;;  %v332_v9 = vadd.f32 %v324_v30, %v308_v27 }
  0xb5   :  { %v193_v10 = vpop.permute.xlu1 %192  ;;  %v189_v11 = vpop.permute.xlu0 %188  ;;  %v210_v12 = vadd.f32 %v202_v31, %v167_v36  ;;  %v214_v13 = vadd.f32 %v206_v3, %v171_v37  ;;  %v327_v14 = vadd.f32 %v319_v4, %v303_v42  ;;  %v331_v15 = vadd.f32 %v323_v5, %v307_v43 }
  0xb6   :  { %v205_v17 = vmul.f32 %v885_v32, %v193_v10  ;;  %v209_v18 = vmul.f32 %v887_v33, %v193_v10  ;;  %v322_v19 = vmul.f32 %v889_v34, %v193_v10  ;;  %v326_v20 = vmul.f32 %v891_v35, %v193_v10 }
  0xb7   :  { %v204_v21 = vmul.f32 %v885_v32, %v189_v11  ;;  %v208_v23 = vmul.f32 %v887_v33, %v189_v11  ;;  %v321_v22 = vmul.f32 %v889_v34, %v189_v11  ;;  %v325_v24 = vmul.f32 %v891_v35, %v189_v11 }
  0xb8   :  { %v213_v25 = vadd.f32 %v205_v17, %v170_v53  ;;  %v217_v16 = vadd.f32 %v209_v18, %v174_v54  ;;  %v330_v26 = vadd.f32 %v322_v19, %v306_v55  ;;  %v933_v27 = vadd.f32 %v326_v20, %v310_v56 }
  0xb9   :  { %v228_v36 = vpop.permute.xlu1 %227  ;;  %v224_v37 = vpop.permute.xlu0 %223  ;;  %v216_v42 = vadd.f32 %v208_v23, %v173_v59  ;;  %v212_v43 = vadd.f32 %v204_v21, %v169_v57  ;;  %v329_v44 = vadd.f32 %v321_v22, %v305_v60  ;;  %v333_v45 = vadd.f32 %v325_v24, %v309_v61 }
  0xba   :  { %v246_v46 = vmul.f32 %v893_v38, %v228_v36  ;;  %v250_v32 = vmul.f32 %v895_v39, %v228_v36  ;;  %v344_v33 = vmul.f32 %v897_v40, %v228_v36  ;;  %v348_v34 = vmul.f32 %v899_v41, %v228_v36 }
  0xbb   :  { %v245_v35 = vmul.f32 %v893_v38, %v224_v37  ;;  %v249_v47 = vmul.f32 %v895_v39, %v224_v37  ;;  %v343_v48 = vmul.f32 %v897_v40, %v224_v37  ;;  %v347_v49 = vmul.f32 %v899_v41, %v224_v37 }
  0xbc   :  { %v254_v58 = vadd.f32 %v246_v46, %v211_v6  ;;  %v258_v50 = vadd.f32 %v250_v32, %v215_v7  ;;  %v352_v51 = vadd.f32 %v344_v33, %v328_v8  ;;  %v356_v52 = vadd.f32 %v348_v34, %v332_v9 }
  0xbd   :  { %v236_v53 = vpop.permute.xlu1 %235  ;;  %v232_v54 = vpop.permute.xlu0 %231  ;;  %v253_v55 = vadd.f32 %v245_v35, %v210_v12  ;;  %v257_v56 = vadd.f32 %v249_v47, %v214_v13  ;;  %v351_v57 = vadd.f32 %v343_v48, %v327_v14  ;;  %v355_v59 = vadd.f32 %v347_v49, %v331_v15 }
  0xbe   :  { %v248_v60 = vmul.f32 %v893_v38, %v236_v53  ;;  %v252_v61 = vmul.f32 %v895_v39, %v236_v53  ;;  %v948_v62 = vstv %s1033_s0  ;;  %v346_v63 = vmul.f32 %v897_v40, %v236_v53 }
  0xbf   :  { %v247_v1 = vmul.f32 %v893_v38, %v232_v54  ;;  %v251_v28 = vmul.f32 %v895_v39, %v232_v54  ;;  %v345_v29 = vmul.f32 %v897_v40, %v232_v54  ;;  %v385_v3 = vmax.f32 %v254_v58, 0.0 }
  0xc0   :  { %v954_v30 = vadd.f32 %v248_v60, %v213_v25  ;;  %v956_v31 = vadd.f32 %v252_v61, %v217_v16  ;;  %v384_v4 = vmax.f32 %v253_v55, 0.0  ;;  %v389_v5 = vmax.f32 %v258_v50, 0.0 }
  0xc1   :  { %v388_v6 = vmax.f32 %v257_v56, 0.0  ;;  %v259_v7 = vadd.f32 %v251_v28, %v216_v42  ;;  %v255_v8 = vadd.f32 %v247_v1, %v212_v43  ;;  %v405_v9 = vsel %vm401_vm0, %v385_v3, 0.0 }
  0xc2   :  { %v402_v10 = vsel %vm401_vm0, %v384_v4, 0.0  ;;  %v359_v11 = vsub.f32 %v253_v55, %v351_v57  ;;  %v360_v38 = vsub.f32 %v254_v58, %v352_v51  ;;  %v350_v39 = vmul.f32 %v899_v41, %v236_v53  ;;  %406 = vadd.xlane.f32.xlu0 %v405_v9  ;;  %v572_v9 = vld [vmem:[%s1038_s5] sm:$0xff] }
  0xc3   :  { %v349_v40 = vmul.f32 %v899_v41, %v232_v54  ;;  %403 = vadd.xlane.f32.xlu1 %v402_v10  ;;  %v417_v12 = vsel %vm401_vm0, %v389_v5, 0.0  ;;  %v414_v13 = vsel %vm401_vm0, %v388_v6, 0.0  ;;  %v363_v17 = vsub.f32 %v257_v56, %v355_v59 }
  0xc4   :  { %v368_v14 = vmul.f32 %v948_v62, %v359_v11  ;;  %v369_v15 = vmul.f32 %v948_v62, %v360_v38  ;;  %v353_v18 = vadd.f32 %v345_v29, %v329_v44  ;;  %v390_v19 = vmax.f32 %v259_v7, 0.0 }
  0xc5   :  { %v386_v20 = vmax.f32 %v255_v8, 0.0  ;;  %v364_v21 = vsub.f32 %v258_v50, %v356_v52  ;;  %v354_v23 = vadd.f32 %v346_v63, %v330_v26  ;;  %v372_v41 = vmul.f32 %v948_v62, %v363_v17 }
  0xc6   :  { %v376_v22 = vadd.f32 %v368_v14, %v351_v57  ;;  %v377_v24 = vadd.f32 %v369_v15, %v352_v51  ;;  %v361_v25 = vsub.f32 %v255_v8, %v353_v18  ;;  %418 = vadd.xlane.f32.xlu0 %v417_v12  ;;  %v357_v37 = vadd.f32 %v349_v40, %v333_v45  ;;  %v574_v8 = vld [vmem:[%s1038_s5 + $0x10] sm:$0xff] }
  0xc7   :  { %415 = vadd.xlane.f32.xlu1 %v414_v13  ;;  %v373_v16 = vmul.f32 %v948_v62, %v364_v21  ;;  %v362_v36 = vsub.f32 %v954_v30, %v354_v23  ;;  %v380_v42 = vadd.f32 %v372_v41, %v355_v59  ;;  %v420_v44 = vsel %vm401_vm0, %v390_v19, 0.0 }
  0xc8   :  { %v370_v43 = vmul.f32 %v948_v62, %v361_v25  ;;  %v365_v32 = vsub.f32 %v259_v7, %v357_v37  ;;  %v408_v33 = vsel %vm401_vm0, %v386_v20, 0.0  ;;  %v392_v34 = vmax.f32 %v376_v22, 0.0 }
  0xc9   :  { %v381_v46 = vadd.f32 %v373_v16, %v356_v52  ;;  %v371_v26 = vmul.f32 %v948_v62, %v362_v36  ;;  %v393_v35 = vmax.f32 %v377_v24, 0.0  ;;  %v358_v45 = vadd.f32 %v350_v39, %v933_v27 }
  0xca   :  { %v378_v47 = vadd.f32 %v370_v43, %v353_v18  ;;  %421 = vadd.xlane.f32.xlu0 %v420_v44  ;;  %v374_v49 = vmul.f32 %v948_v62, %v365_v32  ;;  %v487_v51 = vsel %vm401_vm0, %v392_v34, 0.0  ;;  %v396_v53 = vmax.f32 %v380_v42, 0.0 }
  0xcb   :  { %409 = vadd.xlane.f32.xlu1 %v408_v33  ;;  %v379_v48 = vadd.f32 %v371_v26, %v354_v23  ;;  %v366_v50 = vsub.f32 %v956_v31, %v358_v45  ;;  %v490_v52 = vsel %vm401_vm0, %v393_v35, 0.0  ;;  %v397_v60 = vmax.f32 %v381_v46, 0.0 }
  0xcc   :  { %v382_v58 = vadd.f32 %v374_v49, %v357_v37  ;;  %v394_v54 = vmax.f32 %v378_v47, 0.0  ;;  %v499_v57 = vsel %vm401_vm0, %v396_v53, 0.0  ;;  %v387_v28 = vmax.f32 %v954_v30, 0.0  ;;  %v575_v30 = vld [vmem:[%s1038_s5 + $0x18] sm:$0xff] }
  0xcd   :  { %v375_v55 = vmul.f32 %v948_v62, %v366_v50  ;;  %v395_v27 = vmax.f32 %v379_v48, 0.0  ;;  %v502_v61 = vsel %vm401_vm0, %v397_v60, 0.0  ;;  %v391_v5 = vmax.f32 %v956_v31, 0.0  ;;  %v573_v31 = vld [vmem:[%s1038_s5 + $0x8] sm:$0xff] }
  0xce   :  { %488 = vadd.xlane.f32.xlu0 %v487_v51  ;;  %v493_v59 = vsel %vm401_vm0, %v394_v54, 0.0  ;;  %v398_v1 = vmax.f32 %v382_v58, 0.0  ;;  %v411_v29 = vsel %vm401_vm0, %v387_v28, 0.0  ;;  %v800_v7 = vmov 0.0  }
  0xcf   :  { %491 = vadd.xlane.f32.xlu1 %v490_v52  ;;  %v383_v56 = vadd.f32 %v375_v55, %v358_v45  ;;  %v496_v63 = vsel %vm401_vm0, %v395_v27, 0.0  ;;  %v423_v6 = vsel %vm401_vm0, %v391_v5, 0.0  ;;  %60 = vst.msk [vmem:[#allocation3] sm:$0x3] %vm58_vm1, %v800_v7  ;;  %59 = vst.msk [vmem:[#allocation2] sm:$0x3] %vm58_vm1, %v800_v7  ;;  %703 = vmatprep.subr.mxu0 %v800_v7 }
  0xd0   :  { %v505_v62 = vsel %vm401_vm0, %v398_v1, 0.0  ;;  %704 = vmatpush3.msra.mxu0 %v575_v30  ;;  %711 = vmatprep.mubr.msk.f32.mxu0 %vm801_vm2, %v800_v7  ;;  %v435_v15 = vand.u32 127, %v69_v0 }
  0xd1   :  { %v399_v3 = vmax.f32 %v383_v56, 0.0  ;;  %705 = vmatprep.subr.mxu0 %v800_v7 }
  0xd2   :  { %500 = vadd.xlane.f32.xlu0 %v499_v57  ;;  %706 = vmatpush3.msra.mxu0 %v574_v8  ;;  %v440_v19 = vadd.s32 4294967288, %v435_v15  ;;  %v454_v20 = vadd.s32 4294967272, %v435_v15  ;;  %v447_v21 = vadd.s32 4294967280, %v435_v15  ;;  %v438_v24 = vsub.s32 %v435_v15, %v853_v2 }
  0xd3   :  { %494 = vadd.xlane.f32.xlu1 %v493_v59  ;;  %v508_v4 = vsel %vm401_vm0, %v399_v3, 0.0  ;;  %707 = vmatprep.subr.mxu0 %v800_v7  ;;  %v802_v15 = vmov 1983009808  }
  0xd4   :  { %708 = vmatpush3.msra.mxu0 %v573_v31  ;;  %v443_v41 = vsub.s32 %v440_v19, %v853_v2  ;;  %v457_v25 = vsub.s32 %v454_v20, %v853_v2  ;;  %v450_v16 = vsub.s32 %v447_v21, %v853_v2 }
  0xd5   :  { %709 = vmatprep.subr.mxu0 %v800_v7 }
  0xd6   :  { %503 = vadd.xlane.f32.xlu0 %v502_v61  ;;  %710 = vmatpush3.msra.mxu0 %v572_v9  ;;  %v486_v54 = vld [vmem:[#allocation3] sm:$0x3] }
  0xd7   :  { %497 = vadd.xlane.f32.xlu1 %v496_v63 }
  0xda   :  { %506 = vadd.xlane.f32.xlu0 %v505_v62 }
  0xdb   :  { %412 = vadd.xlane.f32.xlu1 %v411_v29  ;;  %v400_v29 = vld [vmem:[#allocation2] sm:$0x3] }
  0xde   :  { %509 = vadd.xlane.f32.xlu0 %v508_v4 }
  0xe2   :  { %424 = vadd.xlane.f32.xlu0 %v423_v6 }
 0x14b   :  { %v407_v11 = vpop.xlane.xlu0 %406 }
 0x14c   :  { %v404_v10 = vpop.xlane.xlu1 %403  ;;  %v444_v33 = vrot.slane %v407_v11, %v443_v41 }
 0x14d   :  { %v439_v32 = vrot.slane %v404_v10, %v438_v24  ;;  %v696_v10 = vld [vmem:[%s1039_s6] ss:$0 sm:$0xff]  ;;  %s769_s6 = scalar_lea.vmem %s684_s9, 64 }
 0x14e   :  { %p770_p10 = scmp.ne.s32.totalorder %s684_s9, %s769_s6  ;;  %p775_p12 = scmp.lt.s32.totalorder %s769_s6, %s769_s6 }
 0x14f   :  { %v419_v39 = vpop.xlane.xlu0 %418  ;;  %v446_v27 = vsel %vm445_vm3, %v444_v33, %v439_v32 }
 0x150   :  { %v416_v38 = vpop.xlane.xlu1 %415  ;;  %v468_v48 = vrot.slane %v419_v39, %v443_v41  ;;  %p776_p13 = por %p775_p12, %p774_p11 }
 0x151   :  { %v464_v34 = vrot.slane %v416_v38, %v438_v24 }
 0x152   :  { %p777_p0 = pnand %p776_p13, %p770_p10 }
 0x153   :  { %v422_v12 = vpop.xlane.xlu0 %421  ;;  %v469_v61 = vsel %vm445_vm3, %v468_v48, %v464_v34 }
 0x154   :  { %v410_v40 = vpop.xlane.xlu1 %409  ;;  %v473_v51 = vrot.slane %v422_v12, %v450_v16 }
 0x155   :  { %v451_v50 = vrot.slane %v410_v40, %v450_v16 }
 0x156   :  { %v474_v62 = vsel %vm452_vm4, %v473_v51, %v469_v61 }
 0x157   :  { %v489_v14 = vpop.xlane.xlu0 %488  ;;  %v453_v28 = vsel %vm452_vm4, %v451_v50, %v446_v27 }
 0x158   :  { %v492_v13 = vpop.xlane.xlu1 %491  ;;  %v522_v42 = vrot.slane %v489_v14, %v438_v24 }
 0x159   :  { %v526_v37 = vrot.slane %v492_v13, %v443_v41 }
 0x15b   :  { %v501_v18 = vpop.xlane.xlu0 %500  ;;  %v527_v49 = vsel %vm445_vm3, %v526_v37, %v522_v42 }
 0x15c   :  { %v495_v17 = vpop.xlane.xlu1 %494  ;;  %v541_v46 = vrot.slane %v501_v18, %v438_v24 }
 0x15d   :  { %v531_v0 = vrot.slane %v495_v17, %v450_v16  ;;  %v667_v17 = vunpack.c.l.s4 %v802_v15 }
 0x15f   :  { %v504_v23 = vpop.xlane.xlu0 %503  ;;  %v532_v52 = vsel %vm452_vm4, %v531_v0, %v527_v49  ;;  %v668_v18 = vunpack.c.0.s8 %v667_v17 }
 0x160   :  { %v498_v22 = vpop.xlane.xlu1 %497  ;;  %v545_v43 = vrot.slane %v504_v23, %v443_v41 }
 0x161   :  { %v536_v26 = vrot.slane %v498_v22, %v457_v25  ;;  %v671_v19 = vsub.s32 %v668_v18, %v853_v2 }
 0x162   :  { %v546_v45 = vsel %vm445_vm3, %v545_v43, %v541_v46 }
 0x163   :  { %v507_v36 = vpop.xlane.xlu0 %506  ;;  %v537_v55 = vsel %vm459_vm5, %v536_v26, %v532_v52 }
 0x164   :  { %v550_v44 = vrot.slane %v507_v36, %v450_v16  ;;  %v413_v35 = vpop.xlane.xlu1 %412 }
 0x165   :  { %v458_v56 = vrot.slane %v413_v35, %v457_v25 }
 0x166   :  { %v551_v53 = vsel %vm452_vm4, %v550_v44, %v546_v45 }
 0x167   :  { %v510_v47 = vpop.xlane.xlu0 %509  ;;  %v460_v3 = vsel %vm459_vm5, %v458_v56, %v453_v28 }
 0x168   :  { %v555_v58 = vrot.slane %v510_v47, %v457_v25 }
 0x16a   :  { %v556_v57 = vsel %vm459_vm5, %v555_v58, %v551_v53 }
 0x16b   :  { %v557_v59 = vsel %vm480_vm6, %v556_v57, %v537_v55  ;;  %v425_v60 = vpop.xlane.xlu0 %424 }
 0x16c   :  { %v559_v63 = vadd.f32 %v557_v59, %v486_v54  ;;  %v478_v1 = vrot.slane %v425_v60, %v457_v25 }
 0x16e   :  { %560 = vst.msk [vmem:[#allocation3] sm:$0x3] %vm58_vm1, %v559_v63  ;;  %v479_v4 = vsel %vm459_vm5, %v478_v1, %v474_v62 }
 0x16f   :  { %v481_v5 = vsel %vm480_vm6, %v479_v4, %v460_v3 }
 0x170   :  { %v483_v6 = vadd.f32 %v481_v5, %v400_v29 }
 0x172   :  { %485 = vst.msk [vmem:[#allocation2] sm:$0x3] %vm58_vm1, %v483_v6 }
 0x175   :  { %v565_v7 = vld [vmem:[#allocation3] sm:$0x3] }
 0x176   :  { %v567_v30 = vrot.slane %v565_v7, 6 }
 0x179   :  { %v564_v8 = vld [vmem:[#allocation2] sm:$0x3] }
 0x17a   :  { %v570_v31 = vsel %vm569_vm7, %v564_v8, %v567_v30 }
 0x17b   :  { %v571_v9 = vmul.f32 0.0625, %v570_v31 }
 0x17d   :  { %712 = vmatmul.mubr.msk.f32.vlgmr.msra.gmra.mxu0 %vm583_vm8, %v571_v9 }
 0x23d   :  { %v653_v11 = vpop.f32.mrf.mxu0 }
 0x23e   :  { %v654_v38 = vadd.f32 %v696_v10, %v653_v11 }
 0x23f   :  { %v713_v39 = vpop.f32.mrf.mxu0 }
 0x240   :  { %v657_v40 = vmul.f32 %v654_v38, %v654_v38 }
 0x242   :  { %v659_v12 = vsel %vm658_vm9, %v657_v40, 0.0 }
 0x243   :  { %660 = vadd.xlane.f32.xlu1 %v659_v12 }
 0x2cc   :  { %v661_v13 = vpop.xlane.xlu1 %660 }
 0x2cd   :  { %v662_v14 = vmax.f32 %v661_v13, 1e-24 }
 0x2cf   :  { %727 = vrsqrt.f32 %v662_v14 }
 0x2dc   :  { %v728_v20 = vpop.eup %727 }
 0x2dd   :  { %v664_v21 = vmul.f32 %v728_v20, %v654_v38 }
 0x2df   :  { %v672_v23 = vrot.slane %v664_v21, %v671_v19 }
 0x2e1   :  { %v673_v22 = vcombine.high %v672_v23, %v672_v23  ;;  %676 = vst.msk [vmem:[#allocation10] sm:$0x3] %vm58_vm1, %v672_v23 }
 0x2e3   :  { %677 = vst.msk [vmem:[#allocation10 + $0x2] sm:$0x3] %vm58_vm1, %v673_v22 }
 0x2e4   :  { %780 = shalt.err (!%p777_p0)
}
 0x2e5   :  { %s804_s10 = smov 32   ;;  %s805_s11 = smov 2  }
 0x2e6   :  { %689 = dma.vmem_to_hbm [thread:$0]  %s684_s9, 64, %s1040_s7, [#allocation7], %s804_s10, %s804_s10, %s805_s11  }
 0x2e7   :  { %793 = dma.done.wait [#allocation7], 64  }
 0x2e8   :  { %794 = vsyncadd [#allocation7], 4294967232 }
 0x2e9   :  { %693 = vsyncpa [#allocation6], 1 }
 0x2ea   :  { %694 = vsyncpa [#allocation9], 1 }
 0x2eb   :  { %695 = vsyncpa [#allocation7], 1 }

</bundles_post_ra>
